<compile_context>
chip_gen: v7x
topology: tpu7x:2x2x1
jax: 0.10.0
libtpu: 0.0.40
codegen_flags: <defaults>
</compile_context>

<pallas_src>
import jax
import jax.numpy as jnp
from jax.experimental import pallas as pl
from jax.experimental.pallas import tpu as pltpu

_LANES = 128          # lane-dense slab width (multiple of 128 -> unmasked stores)
_SUBLANES = 8
_MAX_BLOCK_ROWS = 512  # 512 rows x 128 lanes x 4 B = 256 KiB per block per buffer


def _affine_sigmoid_kernel(w_ref, b_ref, x_ref, o_ref):
    # w_ref, b_ref: (1,) scalars in SMEM.  x_ref / o_ref: (block_rows, 128) VMEM tiles.
    w = w_ref[0]
    b = b_ref[0]
    o_ref[...] = jax.nn.sigmoid(x_ref[...] * w + b)


def conv_transpose1x1_sigmoid(x, weight, bias, padding):
    """sigmoid(ConvTranspose2d(1, 1, k=1, s=1, padding=p)(x)).

    x: (N, 1, H, W) f32; weight: (1, 1, 1, 1); bias: (1,).
    """
    N, C, H, W = x.shape
    assert C == 1 and weight.shape == (1, 1, 1, 1) and bias.shape == (1,)
    Ho = H - 2 * padding
    Wo = W - 2 * padding
    if Ho <= 0 or Wo <= 0:
        # Same failure mode PyTorch hits at runtime for this configuration.
        raise ValueError(
            f"ConvTranspose2d(kernel=1, stride=1, padding={padding}) on a {H}x{W} input "
            f"gives non-positive output size {Ho}x{Wo}")

    # Crop in the wrapper (fuses in XLA; the discarded border never reaches the kernel),
    # then flatten into a lane-dense 2-D slab.
    xc = x[:, :, padding:padding + Ho, padding:padding + Wo]
    total = N * C * Ho * Wo
    flat = xc.reshape(total).astype(jnp.float32)

    rows = pl.cdiv(total, _LANES)
    block_rows = min(_MAX_BLOCK_ROWS, pl.cdiv(rows, _SUBLANES) * _SUBLANES)
    rows_padded = pl.cdiv(rows, block_rows) * block_rows
    padded_total = rows_padded * _LANES
    if padded_total != total:
        flat = jnp.pad(flat, (0, padded_total - total))
    slab = flat.reshape(rows_padded, _LANES)

    w_s = weight.reshape(1).astype(jnp.float32)
    b_s = bias.reshape(1).astype(jnp.float32)

    grid = (rows_padded // block_rows,)

    out = pl.pallas_call(
        _affine_sigmoid_kernel,
        out_shape=jax.ShapeDtypeStruct((rows_padded, _LANES), jnp.float32),
        grid=grid,
        in_specs=[
            pl.BlockSpec(memory_space=pltpu.MemorySpace.SMEM),      # weight scalar
            pl.BlockSpec(memory_space=pltpu.MemorySpace.SMEM),      # bias scalar
            pl.BlockSpec((block_rows, _LANES), lambda i: (i, 0)),   # lane-dense input slab
        ],
        out_specs=pl.BlockSpec((block_rows, _LANES), lambda i: (i, 0)),
        compiler_params=pltpu.CompilerParams(
            dimension_semantics=("parallel",)),
    )(w_s, b_s, slab)

    out_flat = out.reshape(padded_total)[:total]
    return out_flat.reshape(N, C, Ho, Wo).astype(x.dtype)


def reference(x, weight, bias, padding):
    Ho = x.shape[2] - 2 * padding
    Wo = x.shape[3] - 2 * padding
    xc = x[:, :, padding:padding + Ho, padding:padding + Wo]
    return jax.nn.sigmoid(xc * weight[0, 0, 0, 0] + bias[0])


if __name__ == "__main__":
    key = jax.random.PRNGKey(0)
    kx, kw, kb, kx2 = jax.random.split(key, 4)

    # Input shape from the module: (1, 1, 6, 6)
    x1 = jax.random.normal(kx, (1, 1, 6, 6), dtype=jnp.float32)

    # ConvTranspose2d(1, 1, kernel_size=(1,1)) parameters (PyTorch default init range is
    # uniform(-1, 1) since fan_in = 1).
    weight = jax.random.uniform(kw, (1, 1, 1, 1), minval=-1.0, maxval=1.0, dtype=jnp.float32)
    bias = jax.random.uniform(kb, (1,), minval=-1.0, maxval=1.0, dtype=jnp.float32)

    # The module's original padding=(10000, 10000) is invalid for a 6x6 input; verify we
    # surface it (like PyTorch's runtime error) rather than silently clamping.
    try:
        conv_transpose1x1_sigmoid(x1, weight, bias, 10000)
        raise AssertionError("expected ValueError for padding=10000")
    except ValueError:
        pass

    padding = 2  # valid demo padding: 6x6 -> 2x2 output
    out = jax.block_until_ready(conv_transpose1x1_sigmoid(x1, weight, bias, padding))
    ref = reference(x1, weight, bias, padding)
    assert out.shape == (1, 1, 2, 2), out.shape
    assert jnp.allclose(out, ref, atol=1e-6), (out, ref)

    # Larger batched check exercising the multi-block (grid >= 2, megacore-parallel) path.
    xb = jax.random.normal(kx2, (128, 1, 38, 38), dtype=jnp.float32)
    out_b = jax.block_until_ready(conv_transpose1x1_sigmoid(xb, weight, bias, 3))
    ref_b = reference(xb, weight, bias, 3)
    assert out_b.shape == (128, 1, 32, 32), out_b.shape
    assert jnp.allclose(out_b, ref_b, atol=1e-6)

    print("KERNEL_OK")
</pallas_src>

<mosaic_0001>
module attributes {stable_mosaic.version = 11 : i64} {
  func.func @_affine_sigmoid_kernel(%arg0: i32, %arg1: memref<1xf32, #tpu.memory_space<smem>>, %arg2: memref<1xf32, #tpu.memory_space<smem>>, %arg3: memref<8x128xf32, #tpu.memory_space<vmem>>, %arg4: memref<8x128xf32, #tpu.memory_space<vmem>>) attributes {dimension_semantics = [#tpu.dimension_semantics<parallel>], iteration_bounds = array<i64: 1>, scalar_prefetch = 0 : i64, scratch_operands = 0 : i64, tpu.core_type = #tpu.core_type<tc>, window_params = [{transform_indices = @transform_0, window_bounds = array<i64: 1>}, {transform_indices = @transform_1, window_bounds = array<i64: 1>}, {transform_indices = @transform_2, window_bounds = array<i64: 8, 128>}, {transform_indices = @transform_3, window_bounds = array<i64: 8, 128>}]} {
    %c0 = arith.constant 0 : index
    %0 = memref.load %arg1[%c0] : memref<1xf32, #tpu.memory_space<smem>>
    %c0_0 = arith.constant 0 : index
    %1 = memref.load %arg2[%c0_0] : memref<1xf32, #tpu.memory_space<smem>>
    %c0_1 = arith.constant 0 : index
    %c0_2 = arith.constant 0 : index
    %2 = vector.load %arg3[%c0_1, %c0_2] : memref<8x128xf32, #tpu.memory_space<vmem>>, vector<8x128xf32>
    %3 = vector.broadcast %0 : f32 to vector<8x128xf32>
    %4 = arith.mulf %2, %3 : vector<8x128xf32>
    %5 = vector.broadcast %1 : f32 to vector<8x128xf32>
    %6 = arith.addf %4, %5 : vector<8x128xf32>
    %7 = arith.negf %6 : vector<8x128xf32>
    %8 = math.exp %7 : vector<8x128xf32>
    %cst = arith.constant 1.000000e+00 : f32
    %9 = vector.broadcast %cst : f32 to vector<8x128xf32>
    %10 = arith.addf %9, %8 : vector<8x128xf32>
    %11 = arith.divf %9, %10 : vector<8x128xf32>
    %c0_3 = arith.constant 0 : index
    %c0_4 = arith.constant 0 : index
    %12 = vector.load %arg4[%c0_3, %c0_4] : memref<8x128xf32, #tpu.memory_space<vmem>>, vector<8x128xf32>
    tpu.vector_store %arg4[%c0_3, %c0_4], %11 {strides = array<i32>} : memref<8x128xf32, #tpu.memory_space<vmem>>, vector<8x128xf32>,
    return
  }
  func.func @transform_0(%arg0: i32) -> i32 {
    %c0_i32 = arith.constant 0 : i32
    %c0_i32_0 = arith.constant 0 : i32
    return %c0_i32 : i32
  }
  func.func @transform_1(%arg0: i32) -> i32 {
    %c0_i32 = arith.constant 0 : i32
    %c0_i32_0 = arith.constant 0 : i32
    return %c0_i32 : i32
  }
  func.func @transform_2(%arg0: i32) -> (i32, i32) {
    %c0_i32 = arith.constant 0 : i32
    %c0_i32_0 = arith.constant 0 : i32
    return %arg0, %c0_i32 : i32, i32
  }
  func.func @transform_3(%arg0: i32) -> (i32, i32) {
    %c0_i32 = arith.constant 0 : i32
    %c0_i32_0 = arith.constant 0 : i32
    return %arg0, %c0_i32 : i32, i32
  }
}

</mosaic_0001>

<bundles_post_ra>
// kernel: tpu_custom_call.1
= control target key start
LH: loop header
LB: loop body
LE: loop exit
PB: predicated region body
PF: predicated region fallthrough
CT: control target
= control target key end

     0   :  { %10 = vsyncpa [#allocation5], 0  ;;  %s165_s0 = inlined_call_operand.<no memory space> [shape: f32[1], index: 0, kind: input, shape index: {}]   ;;  %s166_s1 = inlined_call_operand.<no memory space> [shape: f32[1], index: 1, kind: input, shape index: {}]   ;;  %s167_s2 = inlined_call_operand.hbm [shape: f32[8,128], index: 2, kind: input, shape index: {}]   ;;  %s168_s3 = inlined_call_operand.hbm [shape: f32[8,128], index: 3, kind: output, shape index: {}]  }
   0x1   :  { %11 = vsyncpa [#allocation6], 0  ;;  %s113_s12 = smov [#allocation4]   ;;  %s65_s16 = scalar_lea.hbm %s167_s2, 128 }
   0x2   :  { %s22_s13 = sshll.u32 %s113_s12, 4  ;;  %p66_p0 = scmp.ne.s32.totalorder %s167_s2, %s65_s16  ;;  %s23_s13 = int_to_ptr.vmem [resolvable:$true] %s22_s13 }
   0x3   :  { %p69_p1 = scmp.lt.u32.totalorder %s65_s16, %s167_s2 }
   0x5   :  { %p71_p2 = pnand %p69_p1, %p66_p0 }
   0x7   :  { %74 = shalt.err (!%p71_p2)
}
   0x8   :  { %s75_s21 = scalar_lea.vmem %s23_s13, 128  ;;  %p80_p4 = scmp.lt.s32.totalorder %s23_s13, %s23_s13 }
   0x9   :  { %p76_p3 = scmp.ne.s32.totalorder %s23_s13, %s75_s21  ;;  %p81_p5 = scmp.lt.s32.totalorder %s75_s21, %s75_s21 }
   0xb   :  { %p82_p6 = por %p81_p5, %p80_p4 }
   0xd   :  { %p83_p7 = pnand %p82_p6, %p76_p3 }
   0xf   :  { %86 = shalt.err (!%p83_p7)
}
  0x10   :  { %25 = dma.hbm_to_vmem [thread:$0]  %s167_s2, 128, %s23_s13, [#allocation5]  }
  0x11   :  { %109 = dma.done.wait [#allocation5], 128  }
  0x12   :  { %110 = vsyncadd [#allocation5], 4294967168  ;;  %v32_v0 = vstv %s165_s0  ;;  %v31_v1 = vld [vmem:[#allocation4] sm:$0xff]  ;;  %v34_v2 = vstv %s166_s1  ;;  %s114_s28 = smov [#allocation7]  }
  0x13   :  { %v33_v3 = vmul.f32 %v32_v0, %v31_v1  ;;  %s49_s2 = sshll.u32 %s114_s28, 4  ;;  %s50_s2 = int_to_ptr.vmem [resolvable:$true] %s49_s2 }
  0x14   :  { %s87_s29 = scalar_lea.vmem %s50_s2, 128  ;;  %p92_p9 = scmp.lt.s32.totalorder %s50_s2, %s50_s2 }
  0x15   :  { %v35_v4 = vadd.f32 %v34_v2, %v33_v3  ;;  %p88_p8 = scmp.ne.s32.totalorder %s50_s2, %s87_s29  ;;  %p93_p10 = scmp.lt.s32.totalorder %s87_s29, %s87_s29 }
  0x17   :  { %v58_v5 = vmul.f32 -1.442695, %v35_v4  ;;  %p94_p11 = por %p93_p10, %p92_p9 }
  0x19   :  { %61 = vpow2.f32 %v58_v5  ;;  %p95_p12 = pnand %p94_p11, %p88_p8 }
  0x23   :  { %v62_v6 = vpop.eup %61 }
  0x24   :  { %v39_v7 = vadd.f32 1.0, %v62_v6 }
  0x26   :  { %63 = vrcp.f32 %v39_v7 }
  0x30   :  { %v64_v8 = vpop.eup %63 }
  0x31   :  { %42 = vst [vmem:[#allocation7] sm:$0xff] %v64_v8 }
  0x32   :  { %98 = shalt.err (!%p95_p12)
}
  0x33   :  { %s99_s30 = scalar_lea.hbm %s168_s3, 128 }
  0x34   :  { %p100_p13 = scmp.ne.s32.totalorder %s168_s3, %s99_s30  ;;  %p103_p0 = scmp.lt.u32.totalorder %s99_s30, %s168_s3 }
  0x36   :  { %p105_p1 = pnand %p103_p0, %p100_p13 }
  0x38   :  { %108 = shalt.err (!%p105_p1)
}
  0x39   :  { %52 = dma.vmem_to_hbm [thread:$0]  %s50_s2, 128, %s168_s3, [#allocation6]  }
  0x3a   :  { %111 = dma.done.wait [#allocation6], 128  }
  0x3b   :  { %112 = vsyncadd [#allocation6], 4294967168 }
  0x3c   :  { %56 = vsyncpa [#allocation5], 1 }
  0x3d   :  { %57 = vsyncpa [#allocation6], 1 }

</bundles_post_ra>
